<compile_context>
chip_gen: v7x
topology: tpu7x:2x2x1
jax: 0.10.0
libtpu: 0.0.40
codegen_flags: <defaults>
</compile_context>

<pallas_src>
import jax
import jax.numpy as jnp
from jax.experimental import pallas as pl
from jax.experimental.pallas import tpu as pltpu

_LANE = 128
_SUBLANE = 8


def _round_up(x, m):
    return (x + m - 1) // m * m


def _cdiv(a, b):
    return (a + b - 1) // b


# --------------------------------------------------------------------------
# Kernel: fused actor+critic MLP, 3 matmuls + 2 tanh, narrow merged output.
# --------------------------------------------------------------------------
def _fused_mlp_kernel(x_ref, w1_ref, w2_ref, w3_ref, b12_ref, b3_ref, out_ref):
    # bf16 operands into the MXU (f32 accumulate); bias/tanh in f32.
    x = x_ref[...].astype(jnp.bfloat16)                       # (BT, obs_dim)

    h = jnp.tanh(
        jnp.dot(x, w1_ref[...], preferred_element_type=jnp.float32)
        + b12_ref[0:1, :]                                     # (1, HP) broadcast
    )
    h = jnp.tanh(
        jnp.dot(h.astype(jnp.bfloat16), w2_ref[...],
                preferred_element_type=jnp.float32)
        + b12_ref[1:2, :]
    )
    out = (
        jnp.dot(h.astype(jnp.bfloat16), w3_ref[...],
                preferred_element_type=jnp.float32)
        + b3_ref[...]                                         # (1, OUT_N)
    )
    out_ref[...] = out.astype(out_ref.dtype)                  # narrow store


# --------------------------------------------------------------------------
# Host-side packing of the (torch-layout) parameters into fused blobs.
# --------------------------------------------------------------------------
def pack_params(params, obs_dim, hidden, act_dim):
    """Build fused/padded/bf16 weight blobs once (init time, not per step)."""
    two_act = 2 * act_dim
    hp = _round_up(2 * hidden, _LANE)          # fused + lane-padded hidden width
    out_n = _round_up(two_act + 1, _SUBLANE)   # narrow merged output width

    w1 = jnp.zeros((obs_dim, hp), jnp.float32)
    w1 = w1.at[:, :hidden].set(params["wa1"])
    w1 = w1.at[:, hidden:2 * hidden].set(params["wc1"])

    w2 = jnp.zeros((hp, hp), jnp.float32)
    w2 = w2.at[:hidden, :hidden].set(params["wa2"])
    w2 = w2.at[hidden:2 * hidden, hidden:2 * hidden].set(params["wc2"])

    w3 = jnp.zeros((hp, out_n), jnp.float32)
    w3 = w3.at[:hidden, :two_act].set(params["wa3"])
    w3 = w3.at[hidden:2 * hidden, two_act:two_act + 1].set(params["wc3"])

    b12 = jnp.zeros((2, hp), jnp.float32)
    b12 = b12.at[0, :hidden].set(params["ba1"][0])
    b12 = b12.at[0, hidden:2 * hidden].set(params["bc1"][0])
    b12 = b12.at[1, :hidden].set(params["ba2"][0])
    b12 = b12.at[1, hidden:2 * hidden].set(params["bc2"][0])

    b3 = jnp.zeros((1, out_n), jnp.float32)
    b3 = b3.at[0, :two_act].set(params["ba3"][0])
    b3 = b3.at[0, two_act:two_act + 1].set(params["bc3"][0])

    return dict(
        w1=w1.astype(jnp.bfloat16),
        w2=w2.astype(jnp.bfloat16),
        w3=w3.astype(jnp.bfloat16),
        b12=b12, b3=b3,
        obs_dim=obs_dim, hidden=hidden, act_dim=act_dim,
        hp=hp, out_n=out_n,
    )


# --------------------------------------------------------------------------
# Batch tiling: big tiles (amortize ~0.35us/step), >=2 programs when B > 256
# so v7x's two TensorCores both get work, no wrapper-side padding.
# --------------------------------------------------------------------------
def _choose_batch_tile(B):
    if B <= 256:
        # Single block equal to the full batch (block dim == array dim is
        # always legal); splitting a tiny batch only adds per-step overhead.
        return B, 1
    # Multi-block: tile is a multiple of 256 rows, capped at 1024, sized so the
    # grid has at least 2 programs (megacore). Ragged last tile is masked by
    # Pallas (reads of the pad rows are garbage-but-harmless, writes dropped).
    bt = min(1024, _round_up(_cdiv(B, 2), 256))
    return bt, _cdiv(B, bt)


# --------------------------------------------------------------------------
# Wrapper: launch the kernel over a batch grid, split the merged output.
# --------------------------------------------------------------------------
def simple_custom_model_forward(obs, packed):
    """Returns (logits (B, 2*act_dim), value (B, 1))."""
    B, obs_dim = obs.shape
    hp, out_n = packed["hp"], packed["out_n"]
    two_act = 2 * packed["act_dim"]

    bt, grid = _choose_batch_tile(B)

    # Advisory cost estimate so XLA schedules neighbors around this call.
    mm_flops = 2 * B * (obs_dim * hp + hp * hp + hp * out_n)
    bytes_accessed = (
        B * 4 * (obs_dim + out_n)                              # obs read + out write
        + 2 * (obs_dim * hp + hp * hp + hp * out_n)            # bf16 weights
        + 4 * (2 * hp + out_n)                                 # f32 biases
    )

    out = pl.pallas_call(
        _fused_mlp_kernel,
        out_shape=jax.ShapeDtypeStruct((B, out_n), jnp.float32),
        grid=(grid,),
        in_specs=[
            pl.BlockSpec((bt, obs_dim), lambda i: (i, 0)),     # obs tile
            pl.BlockSpec((obs_dim, hp), lambda i: (0, 0)),     # W1 (resident)
            pl.BlockSpec((hp, hp), lambda i: (0, 0)),          # W2 (resident)
            pl.BlockSpec((hp, out_n), lambda i: (0, 0)),       # W3 (resident)
            pl.BlockSpec((2, hp), lambda i: (0, 0)),           # layer-1/2 biases
            pl.BlockSpec((1, out_n), lambda i: (0, 0)),        # layer-3 bias
        ],
        out_specs=pl.BlockSpec((bt, out_n), lambda i: (i, 0)),
        compiler_params=pltpu.CompilerParams(
            dimension_semantics=("parallel",)),
        cost_estimate=pl.CostEstimate(
            flops=mm_flops,
            transcendentals=2 * B * hp,
            bytes_accessed=bytes_accessed),
    )(obs, packed["w1"], packed["w2"], packed["w3"], packed["b12"],
      packed["b3"])

    logits = out[:, :two_act]
    value = out[:, two_act:two_act + 1]
    return logits, value


# --------------------------------------------------------------------------
# Parameter init in torch nn.Linear layout (unfused; packed separately).
# --------------------------------------------------------------------------
def init_params(key, obs_dim, hidden, act_dim):
    ks = jax.random.split(key, 12)
    two_act = 2 * act_dim

    def lin(kw, kb, fan_in, fan_out):
        bound = 1.0 / jnp.sqrt(jnp.float32(fan_in))
        w = jax.random.uniform(kw, (fan_in, fan_out), jnp.float32, -bound, bound)
        b = jax.random.uniform(kb, (1, fan_out), jnp.float32, -bound, bound)
        return w, b

    wa1, ba1 = lin(ks[0], ks[1], obs_dim, hidden)
    wa2, ba2 = lin(ks[2], ks[3], hidden, hidden)
    wa3, ba3 = lin(ks[4], ks[5], hidden, two_act)
    wc1, bc1 = lin(ks[6], ks[7], obs_dim, hidden)
    wc2, bc2 = lin(ks[8], ks[9], hidden, hidden)
    wc3, bc3 = lin(ks[10], ks[11], hidden, 1)

    return dict(
        wa1=wa1, ba1=ba1, wa2=wa2, ba2=ba2, wa3=wa3, ba3=ba3,
        wc1=wc1, bc1=bc1, wc2=wc2, bc2=bc2, wc3=wc3, bc3=bc3,
    )


class SimpleCustomModelJAX:
    """Mirrors the PyTorch module's forward()/value_function() API."""

    def __init__(self, packed_params):
        self.packed = packed_params
        self.value = None
        self.log_step = 0

    def forward(self, obs, state, seq_lens=None):
        logits, value = simple_custom_model_forward(obs, self.packed)
        self.value = value
        self.log_step += 1  # host-side counter, no device compute
        return logits, state

    def value_function(self):
        return jnp.squeeze(self.value, axis=-1)


if __name__ == "__main__":
    B, OBS_DIM, HIDDEN, ACT_DIM = 8, 16, 32, 2

    key = jax.random.PRNGKey(0)
    k_obs, k_params = jax.random.split(key)
    obs = jax.random.normal(k_obs, (B, OBS_DIM), dtype=jnp.float32)
    params = init_params(k_params, OBS_DIM, HIDDEN, ACT_DIM)
    packed = pack_params(params, OBS_DIM, HIDDEN, ACT_DIM)

    model = SimpleCustomModelJAX(packed)
    logits, state = model.forward(obs, state=[])
    value = model.value_function()
    jax.block_until_ready((logits, value))

    # Reference check against the unfused plain-JAX MLPs (f32).
    def ref_mlp(x, w1, b1, w2, b2, w3, b3):
        h = jnp.tanh(x @ w1 + b1)
        h = jnp.tanh(h @ w2 + b2)
        return h @ w3 + b3

    ref_logits = ref_mlp(obs, params["wa1"], params["ba1"], params["wa2"],
                         params["ba2"], params["wa3"], params["ba3"])
    ref_value = ref_mlp(obs, params["wc1"], params["bc1"], params["wc2"],
                        params["bc2"], params["wc3"], params["bc3"])

    assert logits.shape == (B, 2 * ACT_DIM)
    assert value.shape == (B,)
    # Tolerance loosened vs the f32 reference because the MXU operands/weights
    # are bf16 (explicit decision — acceptable for an RL policy/value head).
    assert jnp.allclose(logits, ref_logits, atol=3e-2, rtol=3e-2)
    assert jnp.allclose(value, jnp.squeeze(ref_value, -1), atol=3e-2, rtol=3e-2)

    print("KERNEL_OK")
</pallas_src>

<mosaic_0001>
module attributes {stable_mosaic.version = 11 : i64} {
  func.func @_fused_mlp_kernel(%arg0: i32, %arg1: memref<8x16xf32, #tpu.memory_space<vmem>>, %arg2: memref<16x128xbf16, #tpu.memory_space<vmem>>, %arg3: memref<128x128xbf16, #tpu.memory_space<vmem>>, %arg4: memref<128x8xbf16, #tpu.memory_space<vmem>>, %arg5: memref<2x128xf32, #tpu.memory_space<vmem>>, %arg6: memref<1x8xf32, #tpu.memory_space<vmem>>, %arg7: memref<8x8xf32, #tpu.memory_space<vmem>>) attributes {dimension_semantics = [#tpu.dimension_semantics<parallel>], iteration_bounds = array<i64: 1>, scalar_prefetch = 0 : i64, scratch_operands = 0 : i64, tpu.core_type = #tpu.core_type<tc>, window_params = [{transform_indices = @transform_0, window_bounds = array<i64: 8, 16>}, {pipeline_mode = #tpu.pipeline_mode<synchronous>, transform_indices = @transform_1, window_bounds = array<i64: 16, 128>}, {pipeline_mode = #tpu.pipeline_mode<synchronous>, transform_indices = @transform_2, window_bounds = array<i64: 128, 128>}, {pipeline_mode = #tpu.pipeline_mode<synchronous>, transform_indices = @transform_3, window_bounds = array<i64: 128, 8>}, {pipeline_mode = #tpu.pipeline_mode<synchronous>, transform_indices = @transform_4, window_bounds = array<i64: 2, 128>}, {pipeline_mode = #tpu.pipeline_mode<synchronous>, transform_indices = @transform_5, window_bounds = array<i64: 1, 8>}, {transform_indices = @transform_6, window_bounds = array<i64: 8, 8>}]} {
    %c0 = arith.constant 0 : index
    %c0_0 = arith.constant 0 : index
    %0 = vector.load %arg1[%c0, %c0_0] : memref<8x16xf32, #tpu.memory_space<vmem>>, vector<8x16xf32>
    %1 = arith.truncf %0 : vector<8x16xf32> to vector<8x16xbf16>
    %c0_1 = arith.constant 0 : index
    %c0_2 = arith.constant 0 : index
    %2 = vector.load %arg2[%c0_1, %c0_2] : memref<16x128xbf16, #tpu.memory_space<vmem>>, vector<16x128xbf16>
    %cst = arith.constant dense<0.000000e+00> : vector<8x128xf32>
    %3 = tpu.matmul %1, %2, %cst {dimension_numbers = #tpu.dot_dimension_numbers<[1], [0], [0], [1], [0, 0, 1, 1], [], []>} : vector<8x16xbf16>, vector<16x128xbf16>, vector<8x128xf32> -> vector<8x128xf32>
    %c0_3 = arith.constant 0 : index
    %c0_4 = arith.constant 0 : index
    %4 = vector.load %arg5[%c0_3, %c0_4] : memref<2x128xf32, #tpu.memory_space<vmem>>, vector<1x128xf32>
    %5 = vector.broadcast %4 : vector<1x128xf32> to vector<8x128xf32>
    %6 = arith.addf %3, %5 : vector<8x128xf32>
    %7 = math.tanh %6 : vector<8x128xf32>
    %8 = arith.truncf %7 : vector<8x128xf32> to vector<8x128xbf16>
    %c0_5 = arith.constant 0 : index
    %c0_6 = arith.constant 0 : index
    %9 = vector.load %arg3[%c0_5, %c0_6] : memref<128x128xbf16, #tpu.memory_space<vmem>>, vector<128x128xbf16>
    %cst_7 = arith.constant dense<0.000000e+00> : vector<8x128xf32>
    %10 = tpu.matmul %8, %9, %cst_7 {dimension_numbers = #tpu.dot_dimension_numbers<[1], [0], [0], [1], [0, 0, 1, 1], [], []>} : vector<8x128xbf16>, vector<128x128xbf16>, vector<8x128xf32> -> vector<8x128xf32>
    %c1 = arith.constant 1 : index
    %c0_8 = arith.constant 0 : index
    %11 = vector.load %arg5[%c1, %c0_8] : memref<2x128xf32, #tpu.memory_space<vmem>>, vector<1x128xf32>
    %12 = vector.broadcast %11 : vector<1x128xf32> to vector<8x128xf32>
    %13 = arith.addf %10, %12 : vector<8x128xf32>
    %14 = math.tanh %13 : vector<8x128xf32>
    %15 = arith.truncf %14 : vector<8x128xf32> to vector<8x128xbf16>
    %c0_9 = arith.constant 0 : index
    %c0_10 = arith.constant 0 : index
    %16 = vector.load %arg4[%c0_9, %c0_10] : memref<128x8xbf16, #tpu.memory_space<vmem>>, vector<128x8xbf16>
    %cst_11 = arith.constant dense<0.000000e+00> : vector<8x8xf32>
    %17 = tpu.matmul %15, %16, %cst_11 {dimension_numbers = #tpu.dot_dimension_numbers<[1], [0], [0], [1], [0, 0, 1, 1], [], []>} : vector<8x128xbf16>, vector<128x8xbf16>, vector<8x8xf32> -> vector<8x8xf32>
    %c0_12 = arith.constant 0 : index
    %c0_13 = arith.constant 0 : index
    %18 = vector.load %arg6[%c0_12, %c0_13] : memref<1x8xf32, #tpu.memory_space<vmem>>, vector<1x8xf32>
    %19 = vector.broadcast %18 : vector<1x8xf32> to vector<8x8xf32>
    %20 = arith.addf %17, %19 : vector<8x8xf32>
    %c0_14 = arith.constant 0 : index
    %c0_15 = arith.constant 0 : index
    %21 = vector.load %arg7[%c0_14, %c0_15] : memref<8x8xf32, #tpu.memory_space<vmem>>, vector<8x8xf32>
    tpu.vector_store %arg7[%c0_14, %c0_15], %20 {strides = array<i32>} : memref<8x8xf32, #tpu.memory_space<vmem>>, vector<8x8xf32>,
    return
  }
  func.func @transform_0(%arg0: i32) -> (i32, i32) {
    %c0_i32 = arith.constant 0 : i32
    %c0_i32_0 = arith.constant 0 : i32
    return %arg0, %c0_i32 : i32, i32
  }
  func.func @transform_1(%arg0: i32) -> (i32, i32) {
    %c0_i32 = arith.constant 0 : i32
    %c0_i32_0 = arith.constant 0 : i32
    %c0_i32_1 = arith.constant 0 : i32
    return %c0_i32, %c0_i32_0 : i32, i32
  }
  func.func @transform_2(%arg0: i32) -> (i32, i32) {
    %c0_i32 = arith.constant 0 : i32
    %c0_i32_0 = arith.constant 0 : i32
    %c0_i32_1 = arith.constant 0 : i32
    return %c0_i32, %c0_i32_0 : i32, i32
  }
  func.func @transform_3(%arg0: i32) -> (i32, i32) {
    %c0_i32 = arith.constant 0 : i32
    %c0_i32_0 = arith.constant 0 : i32
    %c0_i32_1 = arith.constant 0 : i32
    return %c0_i32, %c0_i32_0 : i32, i32
  }
  func.func @transform_4(%arg0: i32) -> (i32, i32) {
    %c0_i32 = arith.constant 0 : i32
    %c0_i32_0 = arith.constant 0 : i32
    %c0_i32_1 = arith.constant 0 : i32
    return %c0_i32, %c0_i32_0 : i32, i32
  }
  func.func @transform_5(%arg0: i32) -> (i32, i32) {
    %c0_i32 = arith.constant 0 : i32
    %c0_i32_0 = arith.constant 0 : i32
    %c0_i32_1 = arith.constant 0 : i32
    return %c0_i32, %c0_i32_0 : i32, i32
  }
  func.func @transform_6(%arg0: i32) -> (i32, i32) {
    %c0_i32 = arith.constant 0 : i32
    %c0_i32_0 = arith.constant 0 : i32
    return %arg0, %c0_i32 : i32, i32
  }
}

</mosaic_0001>

<bundles_post_ra>
// kernel: tpu_custom_call.1
= control target key start
LH: loop header
LB: loop body
LE: loop exit
PB: predicated region body
PF: predicated region fallthrough
CT: control target
= control target key end

     0   :  { %11 = vsyncpa [#allocation3], 0  ;;  %s649_s0 = inlined_call_operand.vmem [shape: f32[8,16], index: 0, kind: input, shape index: {}]   ;;  %s650_s1 = inlined_call_operand.hbm [shape: bf16[16,128], index: 1, kind: input, shape index: {}]   ;;  %s651_s2 = inlined_call_operand.vmem [shape: bf16[128,128], index: 2, kind: input, shape index: {}]   ;;  %s652_s3 = inlined_call_operand.vmem [shape: bf16[128,8], index: 3, kind: input, shape index: {}]   ;;  %s653_s4 = inlined_call_operand.vmem [shape: f32[2,128], index: 4, kind: input, shape index: {}]   ;;  %s654_s5 = inlined_call_operand.vmem [shape: f32[1,8], index: 5, kind: input, shape index: {}]   ;;  %s655_s6 = inlined_call_operand.hbm [shape: f32[8,8], index: 6, kind: output, shape index: {}]  }
   0x1   :  { %12 = vsyncpa [#allocation4], 0  ;;  %s501_s21 = smov [#allocation2]   ;;  %s453_s25 = scalar_lea.hbm %s650_s1, 128 }
   0x2   :  { %s20_s22 = sshll.u32 %s501_s21, 4  ;;  %p454_p0 = scmp.ne.s32.totalorder %s650_s1, %s453_s25  ;;  %s21_s22 = int_to_ptr.vmem [resolvable:$true] %s20_s22 }
   0x3   :  { %p457_p1 = scmp.lt.u32.totalorder %s453_s25, %s650_s1 }
   0x5   :  { %p459_p2 = pnand %p457_p1, %p454_p0 }
   0x7   :  { %462 = shalt.err (!%p459_p2)
}
   0x8   :  { %s463_s30 = scalar_lea.vmem %s21_s22, 128  ;;  %p468_p4 = scmp.lt.s32.totalorder %s21_s22, %s21_s22 }
   0x9   :  { %p464_p3 = scmp.ne.s32.totalorder %s21_s22, %s463_s30  ;;  %p469_p5 = scmp.lt.s32.totalorder %s463_s30, %s463_s30 }
   0xb   :  { %p470_p6 = por %p469_p5, %p468_p4 }
   0xd   :  { %p471_p7 = pnand %p470_p6, %p464_p3 }
   0xf   :  { %474 = shalt.err (!%p471_p7)
}
  0x10   :  { %s502_s7 = smov 64   ;;  %s503_s8 = smov 4  }
  0x11   :  { %26 = dma.hbm_to_vmem [thread:$0]  %s650_s1, 128, %s21_s22, [#allocation3], %s502_s7, %s502_s7, %s503_s8  }
  0x12   :  { %497 = dma.done.wait [#allocation3], 128  }
  0x13   :  { %498 = vsyncadd [#allocation3], 4294967168  ;;  %v504_v0 = vmov 0.0   ;;  %vm505_vm0 = vmmov 0   ;;  %v432_v1 = vld [vmem:[#allocation2] sm:$0xff]   ;;  %vm54_vm1 = vcmask 130048  }
  0x14   :  { %380 = vmatprep.subr.bf16.mxu0 %v504_v0  ;;  %382 = vmatprep.mubr.msk.bf16.mxu0 %vm505_vm0, %v504_v0  ;;  %v39_v2 = vld [vmem:[%s649_s0] sm:$0xff]  ;;  %v434_v5 = vld [vmem:[%s651_s2 + $0x8] sm:$0xff]   ;;  %v435_v6 = vld [vmem:[%s651_s2 + $0x10] sm:$0xff]   ;;  %s506_s22 = smov [#allocation5]   ;;  %vm322_vm2 = vcmask 64512  }
  0x15   :  { %386 = vmatprep.subr.bf16.mxu1 %v504_v0  ;;  %402 = vmatprep.mubr.msk.bf16.mxu1 %vm505_vm0, %v504_v0  ;;  %v40_v3 = vpack.c.bf16 %v39_v2, %v39_v2  ;;  %v433_v4 = vld [vmem:[%s651_s2] sm:$0xff]   ;;  %v436_v7 = vld [vmem:[%s651_s2 + $0x18] sm:$0xff]   ;;  %v438_v9 = vld [vmem:[%s651_s2 + $0x28] sm:$0xff]  }
  0x16   :  { %381 = vmatpush3.bf16.msra.mxu0 %v432_v1  ;;  %387 = vmatpush3.bf16.msra.mxu1 %v433_v4  ;;  %v437_v8 = vld [vmem:[%s651_s2 + $0x20] sm:$0xff]   ;;  %v439_v10 = vld [vmem:[%s651_s2 + $0x30] sm:$0xff]   ;;  %v440_v11 = vld [vmem:[%s651_s2 + $0x38] sm:$0xff]  }
  0x17   :  { %406 = vmatprep.subr.bf16.mxu0 %v504_v0  ;;  %388 = vmatprep.subr.bf16.mxu1 %v504_v0  ;;  %v441_v12 = vld [vmem:[%s652_s3] sm:$0xff]   ;;  %v442_v13 = vld [vmem:[%s652_s3 + $0x8] sm:$0xff]   ;;  %v443_v14 = vld [vmem:[%s652_s3 + $0x10] sm:$0xff]  }
  0x18   :  { %v444_v15 = vld [vmem:[%s652_s3 + $0x18] sm:$0xff]   ;;  %v339_v16 = vld [vmem:[%s653_s4] ss:$0 sm:$0xff]  ;;  %v446_v25 = vld [vmem:[%s652_s3 + $0x28] sm:$0xff]  }
  0x19   :  { %383 = vmatmul.mubr.msk.bf16.vlgmr.msra.gmra.mrb[0].mxu0 %vm54_vm1, %v40_v3  ;;  %v445_v24 = vld [vmem:[%s652_s3 + $0x20] sm:$0xff]   ;;  %v447_v26 = vld [vmem:[%s652_s3 + $0x30] sm:$0xff]   ;;  %v448_v27 = vld [vmem:[%s652_s3 + $0x38] sm:$0xff]   ;;  %s330_s3 = sshll.u32 %s506_s22, 4  ;;  %s331_s3 = int_to_ptr.vmem [resolvable:$true] %s330_s3 }
  0x1a   :  { %422 = vmatprep.mubr.msk.bf16.mxu0 %vm505_vm0, %v504_v0  ;;  %389 = vmatpush3.bf16.msra.mxu1 %v434_v5  ;;  %v342_v28 = vld [vmem:[%s653_s4 + $0x1] ss:$0 sm:$0xff]  ;;  %v351_v36 = vld [vmem:[%s654_s5] ss:$0 sm:$0xff]  ;;  %s475_s4 = scalar_lea.vmem %s331_s3, 128  ;;  %p480_p9 = scmp.lt.s32.totalorder %s331_s3, %s331_s3 }
  0x1b   :  { %390 = vmatprep.subr.bf16.mxu1 %v504_v0  ;;  %407 = vmatpush3.bf16.msra.mxu0 %v441_v12  ;;  %p476_p8 = scmp.ne.s32.totalorder %s331_s3, %s475_s4  ;;  %p481_p10 = scmp.lt.s32.totalorder %s475_s4, %s475_s4 }
  0x1c   :  { %408 = vmatprep.subr.bf16.mxu0 %v504_v0 }
  0x1d   :  { %p482_p11 = por %p481_p10, %p480_p9 }
  0x1e   :  { %391 = vmatpush3.bf16.msra.mxu1 %v435_v6 }
  0x1f   :  { %392 = vmatprep.subr.bf16.mxu1 %v504_v0  ;;  %409 = vmatpush3.bf16.msra.mxu0 %v442_v13  ;;  %p483_p12 = pnand %p482_p11, %p476_p8 }
  0x20   :  { %410 = vmatprep.subr.bf16.mxu0 %v504_v0 }
  0x22   :  { %393 = vmatpush3.bf16.msra.mxu1 %v436_v7 }
  0x23   :  { %394 = vmatprep.subr.bf16.mxu1 %v504_v0  ;;  %411 = vmatpush3.bf16.msra.mxu0 %v443_v14 }
  0x24   :  { %412 = vmatprep.subr.bf16.mxu0 %v504_v0 }
  0x26   :  { %395 = vmatpush3.bf16.msra.mxu1 %v437_v8 }
  0x27   :  { %396 = vmatprep.subr.bf16.mxu1 %v504_v0  ;;  %413 = vmatpush3.bf16.msra.mxu0 %v444_v15 }
  0x28   :  { %414 = vmatprep.subr.bf16.mxu0 %v504_v0 }
  0x2a   :  { %397 = vmatpush3.bf16.msra.mxu1 %v438_v9 }
  0x2b   :  { %398 = vmatprep.subr.bf16.mxu1 %v504_v0  ;;  %415 = vmatpush3.bf16.msra.mxu0 %v445_v24 }
  0x2c   :  { %416 = vmatprep.subr.bf16.mxu0 %v504_v0 }
  0x2e   :  { %399 = vmatpush3.bf16.msra.mxu1 %v439_v10 }
  0x2f   :  { %400 = vmatprep.subr.bf16.mxu1 %v504_v0  ;;  %417 = vmatpush3.bf16.msra.mxu0 %v446_v25 }
  0x30   :  { %418 = vmatprep.subr.bf16.mxu0 %v504_v0 }
  0x32   :  { %401 = vmatpush3.bf16.msra.mxu1 %v440_v11 }
  0x33   :  { %419 = vmatpush3.bf16.msra.mxu0 %v447_v26 }
  0x34   :  { %420 = vmatprep.subr.bf16.mxu0 %v504_v0 }
  0x37   :  { %421 = vmatpush3.bf16.msra.mxu0 %v448_v27 }
  0xec   :  { %v92_v17 = vpop.f32.mrb[0].mxu0 }
  0xed   :  { %v93_v18 = vadd.f32 %v339_v16, %v92_v17  ;;  %v384_v19 = vpop.f32.mrb[1].mxu0 }
  0xee   :  { %v95_v20 = vpop.f32.mrb[2].mxu0 }
  0xef   :  { %449 = vtanh.f32 %v93_v18  ;;  %v385_v21 = vpop.f32.mrb[3].mxu0 }
  0xf9   :  { %v450_v22 = vpop.eup %449 }
  0xfa   :  { %v99_v23 = vpack.c.bf16 %v450_v22, %v450_v22 }
  0xfc   :  { %403 = vmatmul.mubr.bf16.vlgmr.msra.gmra.mrb[0].mxu1 %v99_v23 }
 0x1cf   :  { %v203_v29 = vpop.f32.mrb[0].mxu1 }
 0x1d0   :  { %v204_v30 = vadd.f32 %v342_v28, %v203_v29  ;;  %v404_v31 = vpop.f32.mrb[1].mxu1 }
 0x1d1   :  { %v206_v32 = vpop.f32.mrb[2].mxu1 }
 0x1d2   :  { %451 = vtanh.f32 %v204_v30  ;;  %v405_v33 = vpop.f32.mrb[3].mxu1 }
 0x1dc   :  { %v452_v34 = vpop.eup %451 }
 0x1dd   :  { %v210_v35 = vpack.c.bf16 %v452_v34, %v452_v34 }
 0x1df   :  { %423 = vmatmul.mubr.bf16.vlgmr.msra.gmra.mrb[4].mxu0 %v210_v35 }
 0x2b2   :  { %v316_v37 = vpop.f32.mrb[4].mxu0 }
 0x2b3   :  { %v317_v38 = vadd.f32 %v351_v36, %v316_v37  ;;  %v424_v39 = vpop.f32.mrb[5].mxu0 }
 0x2b4   :  { %v319_v40 = vpop.f32.mrb[6].mxu0 }
 0x2b5   :  { %v425_v41 = vpop.f32.mrb[7].mxu0  ;;  %323 = vst.msk [vmem:[#allocation5] sm:$0xff] %vm322_vm2, %v317_v38 }
 0x2b6   :  { %486 = shalt.err (!%p483_p12)
}
 0x2b7   :  { %s487_s5 = scalar_lea.hbm %s655_s6, 128 }
 0x2b8   :  { %p488_p13 = scmp.ne.s32.totalorder %s655_s6, %s487_s5  ;;  %p491_p0 = scmp.lt.u32.totalorder %s487_s5, %s655_s6 }
 0x2ba   :  { %p493_p1 = pnand %p491_p0, %p488_p13 }
 0x2bc   :  { %496 = shalt.err (!%p493_p1)
}
 0x2bd   :  { %333 = dma.vmem_to_hbm [thread:$0]  %s331_s3, 128, %s655_s6, [#allocation4]  }
 0x2be   :  { %499 = dma.done.wait [#allocation4], 128  }
 0x2bf   :  { %500 = vsyncadd [#allocation4], 4294967168 }
 0x2c0   :  { %337 = vsyncpa [#allocation3], 1 }
 0x2c1   :  { %338 = vsyncpa [#allocation4], 1 }

</bundles_post_ra>
